<compile_context>
chip_gen: v5e
topology: v5e:2x2
jax: 0.10.0
libtpu: 0.0.40
codegen_flags: <defaults>
</compile_context>

<pallas_src>
import jax
import jax.numpy as jnp
from jax.experimental import pallas as pl
from jax.experimental.pallas import tpu as pltpu


def _round_up(x, m):
    return (x + m - 1) // m * m


def mlp_kernel(x_ref, w1_ref, b1_ref, w2_ref, b2_ref, o_ref):
    # fc1: bf16 operands -> MXU, f32 accumulate; bias + ReLU in f32 on the VPU.
    h = jnp.dot(x_ref[...], w1_ref[...], preferred_element_type=jnp.float32)
    h = jnp.maximum(h + b1_ref[...], 0.0)
    # fc2: cast activation back to the MXU operand dtype, accumulate in f32.
    logits = jnp.dot(h.astype(w2_ref.dtype), w2_ref[...],
                     preferred_element_type=jnp.float32) + b2_ref[...]
    # LogSoftmax over the feature axis, numerically stable (max/sum -> XLU, exp -> EUP).
    m = jnp.max(logits, axis=-1, keepdims=True)
    shifted = logits - m
    lse = jnp.log(jnp.sum(jnp.exp(shifted), axis=-1, keepdims=True))
    o_ref[...] = (shifted - lse).astype(o_ref.dtype)


def mlp_forward(x, w1, b1, w2, b2, *, block_batch=512, compute_dtype=jnp.bfloat16):
    batch, hidden = x.shape
    mid = w1.shape[1]
    common = w2.shape[1]

    # Lane-dense padding: feature dims to multiples of 128; batch to the tile size.
    hid_p = _round_up(hidden, 128)
    mid_p = _round_up(mid, 128)
    com_p = _round_up(common, 128)
    tb = min(block_batch, _round_up(batch, 8))
    batch_p = _round_up(batch, tb)

    # Zero padding is exact for the matmuls / ReLU.  Padded output columns get a
    # -1e30 bias so exp() underflows to 0 and they vanish from the softmax sum.
    xp = jnp.zeros((batch_p, hid_p), compute_dtype).at[:batch, :hidden].set(
        x.astype(compute_dtype))
    w1p = jnp.zeros((hid_p, mid_p), compute_dtype).at[:hidden, :mid].set(
        w1.astype(compute_dtype))
    b1p = jnp.zeros((1, mid_p), jnp.float32).at[:, :mid].set(b1.astype(jnp.float32))
    w2p = jnp.zeros((mid_p, com_p), compute_dtype).at[:mid, :common].set(
        w2.astype(compute_dtype))
    b2p = jnp.full((1, com_p), -1e30, jnp.float32).at[:, :common].set(
        b2.astype(jnp.float32))

    itemsize = jnp.dtype(compute_dtype).itemsize
    # VMEM budget: 2x (double-buffered) x/out tiles + resident weights/biases + h.
    needed = (2 * tb * hid_p * itemsize + 2 * tb * com_p * 4 +
              hid_p * mid_p * itemsize + mid_p * com_p * itemsize +
              (mid_p + com_p) * 4 + 2 * tb * mid_p * 4)
    vmem_limit = int(min(max(2 * needed, 32 * 1024 * 1024), 64 * 1024 * 1024))

    flops = 2 * batch_p * (hid_p * mid_p + mid_p * com_p)
    bytes_accessed = (xp.size * itemsize + w1p.size * itemsize + w2p.size * itemsize +
                      (b1p.size + b2p.size) * 4 + batch_p * com_p * 4)

    out = pl.pallas_call(
        mlp_kernel,
        out_shape=jax.ShapeDtypeStruct((batch_p, com_p), jnp.float32),
        grid_spec=pltpu.PrefetchScalarGridSpec(
            num_scalar_prefetch=0,
            grid=(batch_p // tb,),
            in_specs=[
                pl.BlockSpec((tb, hid_p), lambda i: (i, 0)),      # x: batch-tiled
                pl.BlockSpec((hid_p, mid_p), lambda i: (0, 0)),   # W1: weight-stationary
                pl.BlockSpec((1, mid_p), lambda i: (0, 0)),       # b1
                pl.BlockSpec((mid_p, com_p), lambda i: (0, 0)),   # W2: weight-stationary
                pl.BlockSpec((1, com_p), lambda i: (0, 0)),       # b2
            ],
            out_specs=pl.BlockSpec((tb, com_p), lambda i: (i, 0)),
        ),
        compiler_params=pltpu.CompilerParams(
            dimension_semantics=("parallel",),   # megacore sharding on v7x
            vmem_limit_bytes=vmem_limit,
        ),
        cost_estimate=pl.CostEstimate(
            flops=flops,
            transcendentals=batch_p * com_p,
            bytes_accessed=bytes_accessed,
        ),
    )(xp, w1p, b1p, w2p, b2p)

    return out[:batch, :common]


def xavier_uniform(key, fan_in, fan_out, dtype=jnp.float32):
    # matches nn.init.xavier_uniform_ (gain=1.0)
    limit = (6.0 / (fan_in + fan_out)) ** 0.5
    return jax.random.uniform(key, (fan_in, fan_out), dtype, minval=-limit, maxval=limit)


def init_params(key, hidden_size, common_size):
    mid = hidden_size // 2
    k1, k2, k3, k4 = jax.random.split(key, 4)
    w1 = xavier_uniform(k1, hidden_size, mid)                      # (H, H//2)
    w2 = xavier_uniform(k2, mid, common_size)                      # (H//2, C)
    # PyTorch Linear default bias init: U(-1/sqrt(fan_in), 1/sqrt(fan_in))
    b1_lim = 1.0 / (hidden_size ** 0.5)
    b2_lim = 1.0 / (mid ** 0.5)
    b1 = jax.random.uniform(k3, (1, mid), jnp.float32, -b1_lim, b1_lim)
    b2 = jax.random.uniform(k4, (1, common_size), jnp.float32, -b2_lim, b2_lim)
    return w1, b1, w2, b2


def reference_forward(x, w1, b1, w2, b2, compute_dtype=jnp.float32):
    xc = x.astype(compute_dtype)
    w1c = w1.astype(compute_dtype)
    w2c = w2.astype(compute_dtype)
    h = jnp.dot(xc, w1c, preferred_element_type=jnp.float32) + b1
    h = jnp.maximum(h, 0.0)
    logits = jnp.dot(h.astype(compute_dtype), w2c,
                     preferred_element_type=jnp.float32) + b2
    return jax.nn.log_softmax(logits, axis=1)


if __name__ == "__main__":
    batch_size, hidden_size, common_size = 8, 32, 16

    key = jax.random.PRNGKey(0)
    kx, kp = jax.random.split(key)
    x = jax.random.normal(kx, (batch_size, hidden_size), jnp.float32)
    w1, b1, w2, b2 = init_params(kp, hidden_size, common_size)

    out = mlp_forward(x, w1, b1, w2, b2)
    out = jax.block_until_ready(out)

    assert out.shape == (batch_size, common_size)
    assert bool(jnp.all(jnp.isfinite(out)))

    # Tight check vs. a reference that feeds the MXU the same bf16 operands.
    ref_bf16 = reference_forward(x, w1, b1, w2, b2, compute_dtype=jnp.bfloat16)
    assert jnp.allclose(out, ref_bf16, atol=1e-4, rtol=1e-4)

    # Loose semantic check vs. the full-f32 PyTorch-equivalent forward.
    ref_f32 = reference_forward(x, w1, b1, w2, b2, compute_dtype=jnp.float32)
    assert jnp.allclose(out, ref_f32, atol=1e-1, rtol=1e-1)

    print("KERNEL_OK")
</pallas_src>

<mosaic_0001>
module attributes {stable_mosaic.version = 11 : i64} {
  func.func @mlp_kernel(%arg0: i32, %arg1: memref<8x128xbf16, #tpu.memory_space<vmem>>, %arg2: memref<128x128xbf16, #tpu.memory_space<vmem>>, %arg3: memref<1x128xf32, #tpu.memory_space<vmem>>, %arg4: memref<128x128xbf16, #tpu.memory_space<vmem>>, %arg5: memref<1x128xf32, #tpu.memory_space<vmem>>, %arg6: memref<8x128xf32, #tpu.memory_space<vmem>>) attributes {dimension_semantics = [#tpu.dimension_semantics<parallel>], iteration_bounds = array<i64: 1>, scalar_prefetch = 0 : i64, scratch_operands = 0 : i64, tpu.core_type = #tpu.core_type<tc>, window_params = [{transform_indices = @transform_0, window_bounds = array<i64: 8, 128>}, {pipeline_mode = #tpu.pipeline_mode<synchronous>, transform_indices = @transform_1, window_bounds = array<i64: 128, 128>}, {pipeline_mode = #tpu.pipeline_mode<synchronous>, transform_indices = @transform_2, window_bounds = array<i64: 1, 128>}, {pipeline_mode = #tpu.pipeline_mode<synchronous>, transform_indices = @transform_3, window_bounds = array<i64: 128, 128>}, {pipeline_mode = #tpu.pipeline_mode<synchronous>, transform_indices = @transform_4, window_bounds = array<i64: 1, 128>}, {transform_indices = @transform_5, window_bounds = array<i64: 8, 128>}]} {
    %c0 = arith.constant 0 : index
    %c0_0 = arith.constant 0 : index
    %0 = vector.load %arg1[%c0, %c0_0] : memref<8x128xbf16, #tpu.memory_space<vmem>>, vector<8x128xbf16>
    %c0_1 = arith.constant 0 : index
    %c0_2 = arith.constant 0 : index
    %1 = vector.load %arg2[%c0_1, %c0_2] : memref<128x128xbf16, #tpu.memory_space<vmem>>, vector<128x128xbf16>
    %cst = arith.constant dense<0.000000e+00> : vector<8x128xf32>
    %2 = tpu.matmul %0, %1, %cst {dimension_numbers = #tpu.dot_dimension_numbers<[1], [0], [0], [1], [0, 0, 1, 1], [], []>} : vector<8x128xbf16>, vector<128x128xbf16>, vector<8x128xf32> -> vector<8x128xf32>
    %c0_3 = arith.constant 0 : index
    %c0_4 = arith.constant 0 : index
    %3 = vector.load %arg3[%c0_3, %c0_4] : memref<1x128xf32, #tpu.memory_space<vmem>>, vector<1x128xf32>
    %4 = vector.broadcast %3 : vector<1x128xf32> to vector<8x128xf32>
    %5 = arith.addf %2, %4 : vector<8x128xf32>
    %cst_5 = arith.constant 0.000000e+00 : f32
    %6 = vector.broadcast %cst_5 : f32 to vector<8x128xf32>
    %7 = arith.maximumf %5, %6 : vector<8x128xf32>
    %8 = arith.truncf %7 : vector<8x128xf32> to vector<8x128xbf16>
    %c0_6 = arith.constant 0 : index
    %c0_7 = arith.constant 0 : index
    %9 = vector.load %arg4[%c0_6, %c0_7] : memref<128x128xbf16, #tpu.memory_space<vmem>>, vector<128x128xbf16>
    %cst_8 = arith.constant dense<0.000000e+00> : vector<8x128xf32>
    %10 = tpu.matmul %8, %9, %cst_8 {dimension_numbers = #tpu.dot_dimension_numbers<[1], [0], [0], [1], [0, 0, 1, 1], [], []>} : vector<8x128xbf16>, vector<128x128xbf16>, vector<8x128xf32> -> vector<8x128xf32>
    %c0_9 = arith.constant 0 : index
    %c0_10 = arith.constant 0 : index
    %11 = vector.load %arg5[%c0_9, %c0_10] : memref<1x128xf32, #tpu.memory_space<vmem>>, vector<1x128xf32>
    %12 = vector.broadcast %11 : vector<1x128xf32> to vector<8x128xf32>
    %13 = arith.addf %10, %12 : vector<8x128xf32>
    %cst_11 = arith.constant dense<0xFF800000> : vector<8xf32>
    %14 = vector.multi_reduction <maximumf>, %13, %cst_11 [1] : vector<8x128xf32> to vector<8xf32>
    %15 = vector.shape_cast %14 : vector<8xf32> to vector<8x1xf32>
    %16 = vector.broadcast %15 : vector<8x1xf32> to vector<8x128xf32>
    %17 = arith.subf %13, %16 : vector<8x128xf32>
    %18 = math.exp %17 : vector<8x128xf32>
    %cst_12 = arith.constant dense<0.000000e+00> : vector<8xf32>
    %19 = vector.multi_reduction <add>, %18, %cst_12 [1] : vector<8x128xf32> to vector<8xf32>
    %20 = vector.shape_cast %19 : vector<8xf32> to vector<8x1xf32>
    %21 = math.log %20 : vector<8x1xf32>
    %22 = vector.broadcast %21 : vector<8x1xf32> to vector<8x128xf32>
    %23 = arith.subf %17, %22 : vector<8x128xf32>
    %c0_13 = arith.constant 0 : index
    %c0_14 = arith.constant 0 : index
    %24 = vector.load %arg6[%c0_13, %c0_14] : memref<8x128xf32, #tpu.memory_space<vmem>>, vector<8x128xf32>
    tpu.vector_store %arg6[%c0_13, %c0_14], %23 {strides = array<i32>} : memref<8x128xf32, #tpu.memory_space<vmem>>, vector<8x128xf32>,
    return
  }
  func.func @transform_0(%arg0: i32) -> (i32, i32) {
    %c0_i32 = arith.constant 0 : i32
    %c0_i32_0 = arith.constant 0 : i32
    return %arg0, %c0_i32 : i32, i32
  }
  func.func @transform_1(%arg0: i32) -> (i32, i32) {
    %c0_i32 = arith.constant 0 : i32
    %c0_i32_0 = arith.constant 0 : i32
    %c0_i32_1 = arith.constant 0 : i32
    return %c0_i32, %c0_i32_0 : i32, i32
  }
  func.func @transform_2(%arg0: i32) -> (i32, i32) {
    %c0_i32 = arith.constant 0 : i32
    %c0_i32_0 = arith.constant 0 : i32
    %c0_i32_1 = arith.constant 0 : i32
    return %c0_i32, %c0_i32_0 : i32, i32
  }
  func.func @transform_3(%arg0: i32) -> (i32, i32) {
    %c0_i32 = arith.constant 0 : i32
    %c0_i32_0 = arith.constant 0 : i32
    %c0_i32_1 = arith.constant 0 : i32
    return %c0_i32, %c0_i32_0 : i32, i32
  }
  func.func @transform_4(%arg0: i32) -> (i32, i32) {
    %c0_i32 = arith.constant 0 : i32
    %c0_i32_0 = arith.constant 0 : i32
    %c0_i32_1 = arith.constant 0 : i32
    return %c0_i32, %c0_i32_0 : i32, i32
  }
  func.func @transform_5(%arg0: i32) -> (i32, i32) {
    %c0_i32 = arith.constant 0 : i32
    %c0_i32_0 = arith.constant 0 : i32
    return %arg0, %c0_i32 : i32, i32
  }
}

</mosaic_0001>

<bundles_post_ra>
// kernel: tpu_custom_call.1
= control target key start
LH: loop header
LB: loop body
LE: loop exit
PB: predicated region body
PF: predicated region fallthrough
CT: control target
= control target key end

     0   :  { %10 = vsyncpa [#allocation3], 0  ;;  %s508_s0 = inlined_call_operand.hbm [shape: bf16[8,128], index: 0, kind: input, shape index: {}]   ;;  %s509_s1 = inlined_call_operand.hbm [shape: bf16[128,128], index: 1, kind: input, shape index: {}]   ;;  %s510_s2 = inlined_call_operand.vmem [shape: f32[1,128], index: 2, kind: input, shape index: {}]   ;;  %s511_s3 = inlined_call_operand.hbm [shape: bf16[128,128], index: 3, kind: input, shape index: {}]   ;;  %s512_s4 = inlined_call_operand.vmem [shape: f32[1,128], index: 4, kind: input, shape index: {}]   ;;  %s513_s5 = inlined_call_operand.hbm [shape: f32[8,128], index: 5, kind: output, shape index: {}]  }
   0x1   :  { %11 = vsyncpa [#allocation6], 0  ;;  %s28_s20 = sshll.u32 %s509_s1, 4  ;;  %s29_s20 = int_to_ptr.hbm [resolvable:$true] %s28_s20 }
   0x2   :  { %12 = vsyncpa [#allocation4], 0  ;;  %s454_s21 = smov [#allocation5]   ;;  %s18_s25 = sshll.u32 %s508_s0, 4  ;;  %s19_s25 = int_to_ptr.hbm [resolvable:$true] %s18_s25 }
   0x3   :  { %s30_s22 = sshll.u32 %s454_s21, 4  ;;  %s455_s26 = smov 64   ;;  %s31_s22 = int_to_ptr.vmem [resolvable:$true] %s30_s22 }
   0x4   :  { %s456_s27 = smov 4   ;;  %s457_s28 = smov [#allocation2]  }
   0x5   :  { %36 = dma.hbm_to_vmem [thread:$0]  %s29_s20, 1024, %s31_s22, [#allocation6], %s455_s26, %s455_s26, %s456_s27  }
   0x6   :  { %s20_s29 = sshll.u32 %s457_s28, 4  ;;  %s43_s7 = sshll.u32 %s511_s3, 4  ;;  %s21_s29 = int_to_ptr.vmem [resolvable:$true] %s20_s29  ;;  %s44_s7 = int_to_ptr.hbm [resolvable:$true] %s43_s7 }
   0x7   :  { %23 = dma.hbm_to_vmem [thread:$0]  %s19_s25, 64, %s21_s29, [#allocation3]  }
   0x8   :  { %s458_s1 = smov [#allocation7]  }
   0x9   :  { %s45_s8 = sshll.u32 %s458_s1, 4  ;;  %s46_s8 = int_to_ptr.vmem [resolvable:$true] %s45_s8 }
   0xa   :  { %51 = dma.hbm_to_vmem [thread:$0]  %s44_s7, 1024, %s46_s8, [#allocation6], %s455_s26, %s455_s26, %s456_s27  }
   0xb   :  { %448 = dma.done.wait [#allocation3], 64  }
   0xc   :  { %449 = vsyncadd [#allocation3], 4294967232 }
   0xd   :  { %450 = dma.done.wait [#allocation6], 2048  }
   0xe   :  { %451 = vsyncadd [#allocation6], 4294965248  ;;  %v331_v0 = vld [vmem:[#allocation5 + $0x38] sm:$0xff]  ;;  %v330_v1 = vld [vmem:[#allocation5 + $0x30] sm:$0xff]  ;;  %s249_s14 = sshll.u32 %s513_s5, 4  ;;  %s250_s14 = int_to_ptr.hbm [resolvable:$true] %s249_s14 }
   0xf   :  { %135 = vmatpush.bf16.msra.mxu0 %v331_v0  ;;  %v339_v2 = vld [vmem:[#allocation7 + $0x38] sm:$0xff]  ;;  %v338_v3 = vld [vmem:[#allocation7 + $0x30] sm:$0xff]  ;;  %v329_v4 = vld [vmem:[#allocation5 + $0x28] sm:$0xff] }
  0x10   :  { %218 = vmatpush.bf16.msra.mxu1 %v339_v2  ;;  %v337_v5 = vld [vmem:[#allocation7 + $0x28] sm:$0xff]  ;;  %v328_v6 = vld [vmem:[#allocation5 + $0x20] sm:$0xff]  ;;  %v327_v8 = vld [vmem:[#allocation5 + $0x18] sm:$0xff] }
  0x11   :  { %v336_v7 = vld [vmem:[#allocation7 + $0x20] sm:$0xff]  ;;  %v335_v9 = vld [vmem:[#allocation7 + $0x18] sm:$0xff]  ;;  %v326_v10 = vld [vmem:[#allocation5 + $0x10] sm:$0xff] }
  0x12   :  { %v334_v11 = vld [vmem:[#allocation7 + $0x10] sm:$0xff]  ;;  %v325_v12 = vld [vmem:[#allocation5 + $0x8] sm:$0xff]  ;;  %v324_v13 = vld [vmem:[#allocation5] sm:$0xff] }
  0x13   :  { %136 = vmatpush.bf16.msra.mxu0 %v330_v1  ;;  %v66_v14 = vld [vmem:[#allocation2] sm:$0xf]  ;;  %v333_v15 = vld [vmem:[#allocation7 + $0x8] sm:$0xff]  ;;  %v332_v16 = vld [vmem:[#allocation7] sm:$0xff] }
  0x14   :  { %219 = vmatpush.bf16.msra.mxu1 %v338_v3  ;;  %v346_v17 = vld [vmem:[%s510_s2] ss:$0 sm:$0xff]  ;;  %s459_s2 = smov [#allocation8]  }
  0x15   :  { %v347_v23 = vld [vmem:[%s512_s4] ss:$0 sm:$0xff]  ;;  %s247_s11 = sshll.u32 %s459_s2, 4  ;;  %s248_s11 = int_to_ptr.vmem [resolvable:$true] %s247_s11 }
  0x17   :  { %137 = vmatpush.bf16.msra.mxu0 %v329_v4 }
  0x18   :  { %220 = vmatpush.bf16.msra.mxu1 %v337_v5 }
  0x1b   :  { %138 = vmatpush.bf16.msra.mxu0 %v328_v6 }
  0x1c   :  { %221 = vmatpush.bf16.msra.mxu1 %v336_v7 }
  0x1f   :  { %139 = vmatpush.bf16.msra.mxu0 %v327_v8 }
  0x20   :  { %222 = vmatpush.bf16.msra.mxu1 %v335_v9 }
  0x23   :  { %140 = vmatpush.bf16.msra.mxu0 %v326_v10 }
  0x24   :  { %223 = vmatpush.bf16.msra.mxu1 %v334_v11 }
  0x27   :  { %141 = vmatpush.bf16.msra.mxu0 %v325_v12 }
  0x28   :  { %224 = vmatpush.bf16.msra.mxu1 %v333_v15 }
  0x2b   :  { %142 = vmatpush.bf16.msra.mxu0 %v324_v13 }
  0x2c   :  { %225 = vmatpush.bf16.msra.mxu1 %v332_v16 }
  0x2e   :  { %143 = vmatmul.bf16.vlgmr.msra.gmra.mxu0 %v66_v14 }
  0xab   :  { %v144_v18 = vpop.f32.mrf.mxu0 }
  0xac   :  { %v145_v19 = vadd.f32 %v346_v17, %v144_v18 }
  0xae   :  { %v148_v20 = vmax.f32 %v145_v19, 0.0 }
  0xb0   :  { %v149_v21 = vpack.c.bf16 %v148_v20, %v148_v20 }
  0xb2   :  { %226 = vmatmul.bf16.vlgmr.msra.gmra.mxu1 %v149_v21 }
  0xb3   :  { %v146_v22 = vpop.f32.mrf.mxu0 }
 0x12f   :  { %v227_v24 = vpop.f32.mrf.mxu1 }
 0x130   :  { %v228_v25 = vadd.f32 %v347_v23, %v227_v24 }
 0x132   :  { %231 = vmax.xlane.f32.xlu0 %v228_v25 }
 0x137   :  { %v229_v26 = vpop.f32.mrf.mxu1 }
 0x1a5   :  { %v232_v27 = vpop.xlane.xlu0 %231 }
 0x1a6   :  { %v233_v28 = vsub.f32 %v228_v25, %v232_v27 }
 0x1a8   :  { %v234_v29 = vmul.f32 1.442695, %v233_v28 }
 0x1aa   :  { %348 = vpow2.f32 %v234_v29 }
 0x1b0   :  { %v349_v30 = vpop.eup %348 }
 0x1b1   :  { %236 = vadd.xlane.f32.xlu0 %v349_v30 }
 0x224   :  { %v237_v31 = vpop.xlane.xlu0 %236 }
 0x225   :  { %350 = vlog2.f32 %v237_v31 }
 0x22b   :  { %v351_v32 = vpop.eup %350 }
 0x22c   :  { %v239_v33 = vmul.f32 0.6931472, %v351_v32 }
 0x22e   :  { %v240_v34 = vsub.f32 %v233_v28, %v239_v33 }
 0x230   :  { %241 = vst [vmem:[#allocation8] sm:$0xff] %v240_v34 }
 0x231   :  { %252 = dma.vmem_to_hbm [thread:$0]  %s248_s11, 128, %s250_s14, [#allocation4]  }
 0x232   :  { %452 = dma.done.wait [#allocation4], 128  }
 0x233   :  { %453 = vsyncadd [#allocation4], 4294967168 }
 0x234   :  { %257 = vsyncpa [#allocation3], 1 }
 0x235   :  { %258 = vsyncpa [#allocation6], 1 }
 0x236   :  { %259 = vsyncpa [#allocation4], 1 }

</bundles_post_ra>
